<compile_context>
chip_gen: v7x
topology: tpu7x:2x2x1
jax: 0.10.0
libtpu: 0.0.40
codegen_flags: <defaults>
</compile_context>

<pallas_src>
import functools

import jax
import jax.numpy as jnp
from jax import lax
from jax.experimental import pallas as pl
from jax.experimental.pallas import tpu as pltpu


def _projection_kernel(x_ref, wg_ref, bg_ref, wphi_ref, bphi_ref,
                       phi_ref, g_ref, *, inv_hw, hw_true, tile):
    """x tile (C, T) -> phi^T tile (inter, T), g^T tile (inter, T) (1/HW folded)."""
    x = x_ref[0]                                                  # (C, T) f32
    phi = (jnp.dot(wphi_ref[...], x, preferred_element_type=jnp.float32)
           + bphi_ref[...])
    g = (jnp.dot(wg_ref[...], x, preferred_element_type=jnp.float32)
         + bg_ref[...]) * inv_hw
    # Zero g at padded KV columns so padded positions contribute nothing to y.
    col = (pl.program_id(1) * tile
           + lax.broadcasted_iota(jnp.int32, g.shape, 1))
    g = jnp.where(col < hw_true, g, 0.0)
    phi_ref[0] = phi.astype(phi_ref.dtype)
    g_ref[0] = g.astype(g_ref.dtype)


def _attention_kernel(xq_ref, phiq_ref, phikv_ref, gkv_ref, ww_ref, bw_ref,
                      o_ref, y_acc, *, mm_dtype):
    kv = pl.program_id(2)

    @pl.when(kv == 0)
    def _():
        y_acc[...] = jnp.zeros_like(y_acc)

    # f_blk^T[kv, q] = sum_i phi[i, kv] * phi[i, q]
    #   (TKV, inter) @ (inter, TQ) -> (TKV, TQ)   — canonical MXU matmul.
    f_blk_t = jnp.dot(phikv_ref[0], phiq_ref[0],
                      preferred_element_type=jnp.float32)

    # y^T accumulation: (inter, TQ) += (inter, TKV) @ (TKV, TQ)   — canonical.
    y_acc[...] += jnp.dot(gkv_ref[0], f_blk_t.astype(mm_dtype),
                          preferred_element_type=jnp.float32)

    # Finalize: W conv + bias + residual; lane-dense (HW-on-lanes) store.
    @pl.when(kv == pl.num_programs(2) - 1)
    def _():
        out = (jnp.dot(ww_ref[...], y_acc[...],
                       preferred_element_type=jnp.float32)
               + bw_ref[...] + xq_ref[0])
        o_ref[0] = out.astype(o_ref.dtype)


def _pick_tile(n, candidates):
    for t in candidates:
        if n % t == 0:
            return t
    return n  # unreachable once n is padded to a multiple of 128


def non_local_forward(x, params, *, use_bf16_matmul=True):
    """x: (B, C, H, W) float32 (NCHW, like the PyTorch module)."""
    B, C, H, W = x.shape
    HW = H * W
    inter = C // 2
    mm_dtype = jnp.bfloat16 if use_bf16_matmul else jnp.float32
    mm_bytes = 2 if use_bf16_matmul else 4

    # NCHW -> (B, C, HW) is a free reshape; pad HW up to a lane multiple.
    HWp = ((HW + 127) // 128) * 128
    x_flat = x.reshape(B, C, HW)
    if HWp != HW:
        x_flat = jnp.pad(x_flat, ((0, 0), (0, 0), (0, HWp - HW)))

    wg = params["wg"]                      # (inter, C)
    wphi = params["wphi"]                  # (inter, C)
    ww = params["ww"]                      # (C, inter)
    bg = params["bg"].reshape(inter, 1)
    bphi = params["bphi"].reshape(inter, 1)
    bw = params["bw"].reshape(C, 1)
    # NOTE: theta conv params exist in the module but its output is overwritten
    # before use (dead code in the PyTorch forward), so they are not used here.

    TP = _pick_tile(HWp, (512, 256, 128))            # projection tile
    TQ = _pick_tile(HWp, (512, 256, 128))            # query tile
    TKV = _pick_tile(HWp, (1024, 512, 256, 128))     # key/value tile

    # ---- Pass 1: projections (phi^T, g^T) computed once, stored in mm_dtype ----
    proj_kernel = functools.partial(
        _projection_kernel, inv_hw=1.0 / HW, hw_true=HW, tile=TP)
    phi_t, g_t = pl.pallas_call(
        proj_kernel,
        out_shape=(jax.ShapeDtypeStruct((B, inter, HWp), mm_dtype),
                   jax.ShapeDtypeStruct((B, inter, HWp), mm_dtype)),
        grid_spec=pltpu.PrefetchScalarGridSpec(
            num_scalar_prefetch=0,
            grid=(B, HWp // TP),
            in_specs=[
                pl.BlockSpec((1, C, TP), lambda b, t: (b, 0, t)),   # x tile
                pl.BlockSpec((inter, C), lambda b, t: (0, 0)),      # wg
                pl.BlockSpec((inter, 1), lambda b, t: (0, 0)),      # bg
                pl.BlockSpec((inter, C), lambda b, t: (0, 0)),      # wphi
                pl.BlockSpec((inter, 1), lambda b, t: (0, 0)),      # bphi
            ],
            out_specs=[
                pl.BlockSpec((1, inter, TP), lambda b, t: (b, 0, t)),
                pl.BlockSpec((1, inter, TP), lambda b, t: (b, 0, t)),
            ],
        ),
        compiler_params=pltpu.CompilerParams(
            dimension_semantics=("parallel", "parallel")),
    )(x_flat, wg, bg, wphi, bphi)

    # KV-side phi in row layout so the f-block matmul is canonical.
    # Tiny one-time half-precision transpose (inter x HW per batch) in XLA.
    phi_r = jnp.transpose(phi_t, (0, 2, 1))          # (B, HWp, inter)

    # ---- Pass 2: flash-style attention + W conv + residual -------------------
    attn_kernel = functools.partial(_attention_kernel, mm_dtype=mm_dtype)

    flops = int(B * (4 * HWp * HWp * inter + 2 * HWp * C * inter))
    bytes_accessed = int(B * (2 * C * HWp * 4
                              + inter * HWp * mm_bytes
                              + (HWp // TQ) * 2 * inter * HWp * mm_bytes))

    out_flat = pl.pallas_call(
        attn_kernel,
        out_shape=jax.ShapeDtypeStruct((B, C, HWp), x.dtype),
        grid_spec=pltpu.PrefetchScalarGridSpec(
            num_scalar_prefetch=0,
            grid=(B, HWp // TQ, HWp // TKV),
            in_specs=[
                pl.BlockSpec((1, C, TQ), lambda b, q, k: (b, 0, q)),     # x (residual)
                pl.BlockSpec((1, inter, TQ), lambda b, q, k: (b, 0, q)), # phi^T (q side)
                pl.BlockSpec((1, TKV, inter), lambda b, q, k: (b, k, 0)),# phi rows (kv side)
                pl.BlockSpec((1, inter, TKV), lambda b, q, k: (b, 0, k)),# g^T (kv side)
                pl.BlockSpec((C, inter), lambda b, q, k: (0, 0)),        # ww
                pl.BlockSpec((C, 1), lambda b, q, k: (0, 0)),            # bw
            ],
            out_specs=pl.BlockSpec((1, C, TQ), lambda b, q, k: (b, 0, q)),
            scratch_shapes=[
                pltpu.VMEM((inter, TQ), jnp.float32),   # y^T accumulator
            ],
        ),
        compiler_params=pltpu.CompilerParams(
            dimension_semantics=("parallel", "parallel", "arbitrary"),
            vmem_limit_bytes=48 * 1024 * 1024,   # fits v7x's 64 MiB physical VMEM
        ),
        cost_estimate=pl.CostEstimate(
            flops=flops, transcendentals=0, bytes_accessed=bytes_accessed),
    )(x_flat, phi_t, phi_r, g_t, ww, bw)

    if HWp != HW:
        out_flat = out_flat[:, :, :HW]
    return out_flat.reshape(B, C, H, W)


def init_params(key, in_channels):
    inter = in_channels // 2
    ks = jax.random.split(key, 8)
    scale = 0.1
    return {
        "wg": scale * jax.random.normal(ks[0], (inter, in_channels), jnp.float32),
        "bg": scale * jax.random.normal(ks[1], (inter,), jnp.float32),
        "wtheta": scale * jax.random.normal(ks[2], (inter, in_channels), jnp.float32),  # dead in fwd
        "btheta": scale * jax.random.normal(ks[3], (inter,), jnp.float32),              # dead in fwd
        "wphi": scale * jax.random.normal(ks[4], (inter, in_channels), jnp.float32),
        "bphi": scale * jax.random.normal(ks[5], (inter,), jnp.float32),
        "ww": scale * jax.random.normal(ks[6], (in_channels, inter), jnp.float32),
        "bw": scale * jax.random.normal(ks[7], (in_channels,), jnp.float32),
    }


def _reference_forward(x, params):
    """Pure-JAX reference mirroring the PyTorch code, for verification."""
    B, C, H, W = x.shape
    inter = C // 2
    HW = H * W

    def conv1x1(x, w, b):  # (B,C,H,W), (out,in), (out,)
        return jnp.einsum("bchw,oc->bohw", x, w) + b[None, :, None, None]

    g_x = conv1x1(x, params["wg"], params["bg"]).reshape(B, inter, HW)
    g_x = jnp.transpose(g_x, (0, 2, 1))
    phi_x = conv1x1(x, params["wphi"], params["bphi"]).reshape(B, inter, HW)
    theta_x = jnp.transpose(phi_x, (0, 2, 1))   # matches the PyTorch overwrite
    f = jnp.matmul(theta_x, phi_x)
    f_div_C = f / f.shape[-1]
    y = jnp.matmul(f_div_C, g_x)
    y = jnp.transpose(y, (0, 2, 1)).reshape(B, inter, H, W)
    W_y = conv1x1(y, params["ww"], params["bw"])
    return W_y + x


if __name__ == "__main__":
    key = jax.random.PRNGKey(0)
    kx1, kp1, kx2, kp2 = jax.random.split(key, 4)

    # --- Test 1: lane-aligned HW (256); bf16 default path + f32 path ---
    B, C, H, W = 2, 4, 16, 16
    x = jax.random.normal(kx1, (B, C, H, W), jnp.float32)
    params = init_params(kp1, C)
    ref = _reference_forward(x, params)

    out_bf16 = jax.block_until_ready(non_local_forward(x, params))  # bf16 MXU inputs (default)
    assert out_bf16.shape == (B, C, H, W)
    assert jnp.allclose(out_bf16, ref, atol=2e-2, rtol=2e-2), "bf16 path mismatch vs reference"

    out_f32 = jax.block_until_ready(non_local_forward(x, params, use_bf16_matmul=False))
    assert jnp.allclose(out_f32, ref, atol=1e-4, rtol=1e-4), "f32 path mismatch vs reference"

    # --- Test 2: non-128-multiple HW (196 -> padded to 256, masked KV) ---
    B2, C2, H2, W2 = 1, 8, 14, 14
    x2 = jax.random.normal(kx2, (B2, C2, H2, W2), jnp.float32)
    params2 = init_params(kp2, C2)
    ref2 = _reference_forward(x2, params2)
    out2 = jax.block_until_ready(non_local_forward(x2, params2))
    assert out2.shape == (B2, C2, H2, W2)
    assert jnp.allclose(out2, ref2, atol=2e-2, rtol=2e-2), "padded path mismatch vs reference"

    print("KERNEL_OK")
</pallas_src>

<mosaic_0001>
module attributes {stable_mosaic.version = 11 : i64} {
  func.func @_projection_kernel(%arg0: i32, %arg1: i32, %arg2: memref<1x4x256xf32, #tpu.memory_space<vmem>>, %arg3: memref<2x4xf32, #tpu.memory_space<vmem>>, %arg4: memref<2x1xf32, #tpu.memory_space<vmem>>, %arg5: memref<2x4xf32, #tpu.memory_space<vmem>>, %arg6: memref<2x1xf32, #tpu.memory_space<vmem>>, %arg7: memref<1x2x256xbf16, #tpu.memory_space<vmem>>, %arg8: memref<1x2x256xbf16, #tpu.memory_space<vmem>>) attributes {dimension_semantics = [#tpu.dimension_semantics<parallel>, #tpu.dimension_semantics<parallel>], iteration_bounds = array<i64: 2, 1>, scalar_prefetch = 0 : i64, scratch_operands = 0 : i64, tpu.core_type = #tpu.core_type<tc>, window_params = [{transform_indices = @transform_0, window_bounds = array<i64: 1, 4, 256>}, {pipeline_mode = #tpu.pipeline_mode<synchronous>, transform_indices = @transform_1, window_bounds = array<i64: 2, 4>}, {pipeline_mode = #tpu.pipeline_mode<synchronous>, transform_indices = @transform_2, window_bounds = array<i64: 2, 1>}, {pipeline_mode = #tpu.pipeline_mode<synchronous>, transform_indices = @transform_3, window_bounds = array<i64: 2, 4>}, {pipeline_mode = #tpu.pipeline_mode<synchronous>, transform_indices = @transform_4, window_bounds = array<i64: 2, 1>}, {transform_indices = @transform_5, window_bounds = array<i64: 1, 2, 256>}, {transform_indices = @transform_6, window_bounds = array<i64: 1, 2, 256>}]} {
    %c0 = arith.constant 0 : index
    %c0_0 = arith.constant 0 : index
    %c0_1 = arith.constant 0 : index
    %0 = vector.load %arg2[%c0, %c0_0, %c0_1] : memref<1x4x256xf32, #tpu.memory_space<vmem>>, vector<1x4x256xf32>
    %1 = vector.shape_cast %0 : vector<1x4x256xf32> to vector<4x256xf32>
    %c0_2 = arith.constant 0 : index
    %c0_3 = arith.constant 0 : index
    %2 = vector.load %arg5[%c0_2, %c0_3] : memref<2x4xf32, #tpu.memory_space<vmem>>, vector<2x4xf32>
    %cst = arith.constant dense<0.000000e+00> : vector<2x256xf32>
    %3 = tpu.matmul %2, %1, %cst {dimension_numbers = #tpu.dot_dimension_numbers<[1], [0], [0], [1], [0, 0, 1, 1], [], []>} : vector<2x4xf32>, vector<4x256xf32>, vector<2x256xf32> -> vector<2x256xf32>
    %c0_4 = arith.constant 0 : index
    %c0_5 = arith.constant 0 : index
    %4 = vector.load %arg6[%c0_4, %c0_5] : memref<2x1xf32, #tpu.memory_space<vmem>>, vector<2x1xf32>
    %5 = vector.broadcast %4 : vector<2x1xf32> to vector<2x256xf32>
    %6 = arith.addf %3, %5 : vector<2x256xf32>
    %c0_6 = arith.constant 0 : index
    %c0_7 = arith.constant 0 : index
    %7 = vector.load %arg3[%c0_6, %c0_7] : memref<2x4xf32, #tpu.memory_space<vmem>>, vector<2x4xf32>
    %cst_8 = arith.constant dense<0.000000e+00> : vector<2x256xf32>
    %8 = tpu.matmul %7, %1, %cst_8 {dimension_numbers = #tpu.dot_dimension_numbers<[1], [0], [0], [1], [0, 0, 1, 1], [], []>} : vector<2x4xf32>, vector<4x256xf32>, vector<2x256xf32> -> vector<2x256xf32>
    %c0_9 = arith.constant 0 : index
    %c0_10 = arith.constant 0 : index
    %9 = vector.load %arg4[%c0_9, %c0_10] : memref<2x1xf32, #tpu.memory_space<vmem>>, vector<2x1xf32>
    %10 = vector.broadcast %9 : vector<2x1xf32> to vector<2x256xf32>
    %11 = arith.addf %8, %10 : vector<2x256xf32>
    %cst_11 = arith.constant 3.906250e-03 : f32
    %12 = vector.broadcast %cst_11 : f32 to vector<2x256xf32>
    %13 = arith.mulf %11, %12 : vector<2x256xf32>
    %c256_i32 = arith.constant 256 : i32
    %14 = arith.muli %arg1, %c256_i32 : i32
    %15 = tpu.iota {dimensions = array<i32: 1>} : vector<2x256xi32>
    %16 = vector.broadcast %14 : i32 to vector<2x256xi32>
    %17 = arith.addi %16, %15 : vector<2x256xi32>
    %c256_i32_12 = arith.constant 256 : i32
    %18 = vector.broadcast %c256_i32_12 : i32 to vector<2x256xi32>
    %19 = arith.cmpi slt, %17, %18 : vector<2x256xi32>
    %cst_13 = arith.constant 0.000000e+00 : f32
    %20 = vector.broadcast %cst_13 : f32 to vector<2x256xf32>
    %21 = arith.select %19, %13, %20 : vector<2x256xi1>, vector<2x256xf32>
    %22 = arith.truncf %6 : vector<2x256xf32> to vector<2x256xbf16>
    %c0_14 = arith.constant 0 : index
    %c0_15 = arith.constant 0 : index
    %c0_16 = arith.constant 0 : index
    %23 = vector.load %arg7[%c0_14, %c0_15, %c0_16] : memref<1x2x256xbf16, #tpu.memory_space<vmem>>, vector<1x2x256xbf16>
    %24 = vector.shape_cast %23 : vector<1x2x256xbf16> to vector<2x256xbf16>
    %25 = vector.shape_cast %22 : vector<2x256xbf16> to vector<1x2x256xbf16>
    tpu.vector_store %arg7[%c0_14, %c0_15, %c0_16], %25 {strides = array<i32>} : memref<1x2x256xbf16, #tpu.memory_space<vmem>>, vector<1x2x256xbf16>,
    %26 = arith.truncf %21 : vector<2x256xf32> to vector<2x256xbf16>
    %c0_17 = arith.constant 0 : index
    %c0_18 = arith.constant 0 : index
    %c0_19 = arith.constant 0 : index
    %27 = vector.load %arg8[%c0_17, %c0_18, %c0_19] : memref<1x2x256xbf16, #tpu.memory_space<vmem>>, vector<1x2x256xbf16>
    %28 = vector.shape_cast %27 : vector<1x2x256xbf16> to vector<2x256xbf16>
    %29 = vector.shape_cast %26 : vector<2x256xbf16> to vector<1x2x256xbf16>
    tpu.vector_store %arg8[%c0_17, %c0_18, %c0_19], %29 {strides = array<i32>} : memref<1x2x256xbf16, #tpu.memory_space<vmem>>, vector<1x2x256xbf16>,
    return
  }
  func.func @transform_0(%arg0: i32, %arg1: i32) -> (i32, i32, i32) {
    %c0_i32 = arith.constant 0 : i32
    %c0_i32_0 = arith.constant 0 : i32
    return %arg0, %c0_i32, %arg1 : i32, i32, i32
  }
  func.func @transform_1(%arg0: i32, %arg1: i32) -> (i32, i32) {
    %c0_i32 = arith.constant 0 : i32
    %c0_i32_0 = arith.constant 0 : i32
    %c0_i32_1 = arith.constant 0 : i32
    return %c0_i32, %c0_i32_0 : i32, i32
  }
  func.func @transform_2(%arg0: i32, %arg1: i32) -> (i32, i32) {
    %c0_i32 = arith.constant 0 : i32
    %c0_i32_0 = arith.constant 0 : i32
    %c0_i32_1 = arith.constant 0 : i32
    return %c0_i32, %c0_i32_0 : i32, i32
  }
  func.func @transform_3(%arg0: i32, %arg1: i32) -> (i32, i32) {
    %c0_i32 = arith.constant 0 : i32
    %c0_i32_0 = arith.constant 0 : i32
    %c0_i32_1 = arith.constant 0 : i32
    return %c0_i32, %c0_i32_0 : i32, i32
  }
  func.func @transform_4(%arg0: i32, %arg1: i32) -> (i32, i32) {
    %c0_i32 = arith.constant 0 : i32
    %c0_i32_0 = arith.constant 0 : i32
    %c0_i32_1 = arith.constant 0 : i32
    return %c0_i32, %c0_i32_0 : i32, i32
  }
  func.func @transform_5(%arg0: i32, %arg1: i32) -> (i32, i32, i32) {
    %c0_i32 = arith.constant 0 : i32
    %c0_i32_0 = arith.constant 0 : i32
    return %arg0, %c0_i32, %arg1 : i32, i32, i32
  }
  func.func @transform_6(%arg0: i32, %arg1: i32) -> (i32, i32, i32) {
    %c0_i32 = arith.constant 0 : i32
    %c0_i32_0 = arith.constant 0 : i32
    return %arg0, %c0_i32, %arg1 : i32, i32, i32
  }
}

</mosaic_0001>

<bundles_post_ra>
// kernel: tpu_custom_call.1
= control target key start
LH: loop header
LB: loop body
LE: loop exit
PB: predicated region body
PF: predicated region fallthrough
CT: control target
= control target key end

     0   :  { %12 = vsyncpa [#allocation3], 0  ;;  %s1194_s0 = inlined_call_operand.hbm [shape: f32[2,4,256], index: 0, kind: input, shape index: {}]   ;;  %s1195_s1 = inlined_call_operand.vmem [shape: f32[2,4], index: 1, kind: input, shape index: {}]   ;;  %s1196_s2 = inlined_call_operand.vmem [shape: f32[2,1], index: 2, kind: input, shape index: {}]   ;;  %s1197_s3 = inlined_call_operand.vmem [shape: f32[2,4], index: 3, kind: input, shape index: {}]   ;;  %s1198_s4 = inlined_call_operand.vmem [shape: f32[2,1], index: 4, kind: input, shape index: {}]   ;;  %s1199_s5 = inlined_call_operand.hbm [shape: bf16[2,2,256], index: 5, kind: output, shape index: {0}]   ;;  %s1200_s6 = inlined_call_operand.hbm [shape: bf16[2,2,256], index: 6, kind: output, shape index: {1}]  }
   0x1   :  { %14 = vsyncpa [#allocation3 + $0x1], 0 }
   0x2   :  { %15 = vsyncpa [#allocation4], 0 }
   0x3   :  { %17 = vsyncpa [#allocation4 + $0x1], 0 }
   0x4   :  { %18 = vsyncpa [#allocation7], 0 }
   0x5   :  { %20 = vsyncpa [#allocation7 + $0x1], 0  ;;  %s976_s21 = smov 0   ;;  %s978_s22 = smov 0  }
   0x6   :  { %s980_s23 = smov 0   ;;  %s982_s24 = smov 0  }
   0x7   :  { %s984_s25 = smov 0   ;;  %s986_s26 = smov 0  }
   0x8 LB: > { %s685_s27 = sadd.s32 4294967295, %s933_s26   ;;  %s686_s28 = sadd.s32 4294967294, %s933_s26   ;;  %s933_s26 = sphi %s986_s26, %s26_s26   ;;  %s929_s25 = sphi %s984_s25, %s1216_s25   ;;  %s925_s24 = sphi %s982_s24, %s1215_s24   ;;  %s921_s23 = sphi %s980_s23, %s1214_s23   ;;  %s917_s22 = sphi %s978_s22, %s1213_s22   ;;  %s913_s21 = sphi %s976_s21, %s1212_s21  }
   0x9   : > { %s38_s29 = sadd.s32 1, %s929_s25  ;;  %s47_s30 = sadd.s32 1, %s921_s23 }
   0xa   : > { %p40_p0 = scmp.ge.s32.totalorder %s38_s29, 2  ;;  %p54_p1 = scmp.ne.s32.totalorder %s921_s23, %s917_s22 }
   0xb   : > { %p55_p2 = scmp.eq.s32.totalorder %s933_s26, 0  ;;  %p60_p3 = scmp.ne.s32.totalorder %s917_s22, %s913_s21 }
   0xc   : > { %s1218_s29 = smov (%p40_p0, %s38_s29), 0  ;;  %p61_p5 = scmp.eq.s32.totalorder %s685_s27, 0 }
   0xd   : > { %p1017_p4 = por %p55_p2, %p54_p1  ;;  %s42_s8 = ssub.s32 %s929_s25, %s1218_s29 }
   0xe   : > { %p170_p6 = scmp.eq.s32.totalorder %s685_s27, 1  ;;  %p45_p7 = scmp.eq.s32.totalorder %s42_s8, 0 }
   0xf   : > { %p1023_p8 = por %p61_p5, %p60_p3  ;;  %p176_p10 = scmp.eq.s32.totalorder %s686_s28, 1 }
  0x10   : > { %p1027_p9 = por %p170_p6, %p54_p1  ;;  %p734_p13 = scmp.lt.s32.totalorder %s933_s26, 2 }
  0x11   : > { %s1032_s11 = scalar_select %p45_p7, %s921_s23, %s47_s30  }
  0x12   : > { %s1204_s10 = scalar_select %p1027_p9, 1, 0 }
  0x13   : > { %p1034_p11 = por %p176_p10, %p60_p3  ;;  %s236_s13 = sand.u32 1, %s921_s23  }
  0x14   : > { %s689_s14 = sshll.u32 %s236_s13, 3  ;;  %s714_s15 = sshll.u32 %s929_s25, 7 }
  0x15   : > { %s1205_s12 = scalar_select %p1034_p11, 1, 0 }
  0x16   : > { %s1045_s18 = scalar_lea.hbm %s1194_s0, %s714_s15  ;;  %s240_s19 = scalar_lea.vmem [#allocation2], %s689_s14 }
  0x17   : > { %s250_s20 = sshll.u32 %s240_s19, 4  ;;  %p1051_p0 = pnand %p734_p13, %p1017_p4  ;;  %s1047_s20 = int_to_ptr.vmem [resolvable:$true] %s250_s20 }
  0x18   : > { %s237_s28 = scalar_lea.sflag [#allocation3], %s236_s13  ;;  %s789_s30 = scalar_lea.hbm %s1045_s18, 128 }
  0x19   : > { %p790_p3 = scmp.ne.s32.totalorder %s1045_s18, %s789_s30  ;;  %p791_p5 = pneg %p1051_p0 }
  0x1a   : > { %s794_s7 = scalar_lea.hbm %s1194_s0, 256  ;;  %p795_p4 = scmp.lt.u32.totalorder %s1045_s18, %s1194_s0 }
  0x1b   : > { %p792_p6 = pnand %p791_p5, %p790_p3  ;;  %p796_p10 = scmp.lt.u32.totalorder %s794_s7, %s789_s30 }
  0x1c   : > { %p798_p12 = scmp.lt.u32.totalorder %s789_s30, %s1045_s18 }
  0x1d   : > { %p793_p7 = pneg %p792_p6  ;;  %p797_p13 = por %p796_p10, %p795_p4 }
  0x1f   : > { %p799_p1 = por %p798_p12, %p797_p13 }
  0x21   : > { %p800_p2 = pnand %p799_p1, %p793_p7 }
  0x23   : > { %803 = shalt.err (!%p800_p2)
}
  0x24   : > { %s804_s13 = scalar_lea.vmem %s1047_s20, 128  ;;  %s935_s17 = smov [#allocation2]  }
  0x25   : > { %p805_p3 = scmp.ne.s32.totalorder %s1047_s20, %s804_s13  ;;  %s809_s19 = sshll.u32 %s935_s17, 4  ;;  %s810_s19 = int_to_ptr.vmem [resolvable:$false] %s809_s19 }
  0x26   : > { %s811_s8 = scalar_lea.vmem %s810_s19, 256  ;;  %p812_p9 = scmp.lt.s32.totalorder %s1047_s20, %s810_s19 }
  0x27   : > { %p807_p6 = pnand %p805_p3, %p791_p5  ;;  %p813_p4 = scmp.lt.s32.totalorder %s811_s8, %s804_s13 }
  0x29   : > { %p808_p11 = pneg %p807_p6  ;;  %p814_p10 = por %p813_p4, %p812_p9 }
  0x2b   : > { %p815_p12 = pnand %p814_p10, %p808_p11 }
  0x2d   : > { %818 = shalt.err (!%p815_p12)
}
  0x2e   : > { %726 = dma.hbm_to_vmem [thread:$0]  (!%p1051_p0), %s1045_s18, 128, %s1047_s20, %s237_s28  }
  0x2f   : > { %p1207_p1 = scmp.lt.s32.totalorder %s933_s26, 3  ;;  %p1208_p2 = scmp.ge.s32.totalorder %s933_s26, 1 }
  0x31   : > { %p256_p5 = pnand %p1208_p2, %p1207_p1 }
  0x32   : > { %s1087_s30 = sand.u32 (!%p256_p5), 1, %s917_s22  }
  0x33   : > { %259 = sbr.rel (%p256_p5) target bundleno = 321 (0x141), region = 40  ;;  %s693_s14 = sshll.u32 (!%p256_p5), %s1087_s30, 3 }
  0x34   : > { %s262_s7 = scalar_lea.sflag (!%p256_p5), [#allocation3], %s1087_s30  ;;  %s265_s15 = scalar_lea.vmem (!%p256_p5), [#allocation2], %s693_s14 }
  0x3a   : > { %900 = dma.done.wait (%p1023_p8), %s262_s7, 128  }
  0x3b   : > { %902 = vsyncadd (%p1023_p8), %s262_s7, 4294967168  ;;  %v936_v0 = vmov 0.0   ;;  %v937_v1 = vmov 0   ;;  %v302_v2 = vld [vmem:[%s265_s15] sm:$0xff]  ;;  %vm316_vm0 = vcmask 1043456   ;;  %vm312_vm1 = vcmask 31744  }
  0x3c   : > { %385 = vmatprep.mubr.f32.mxu0 %v936_v0  ;;  %466 = vmatprep.mubr.f32.mxu1 %v936_v0  ;;  %v311_v3 = vcombine.high %v302_v2, %v302_v2  ;;  %v393_v4 = vld [vmem:[%s1196_s2] sm:$0x3]  ;;  %v938_v9 = vmov 1966171168   ;;  %v494_v11 = vlaneseq  ;;  %s694_s19 = sshll.u32 %s1087_s30, 1  ;;  %s715_s8 = sshll.u32 %s925_s24, 5 }
  0x3d   : > { %787 = vset.pattern.permute.xlu0 %v937_v1  ;;  %v303_v5 = vld [vmem:[%s1197_s3] sm:$0x3]  ;;  %v492_v10 = vunpack.c.l.s4 %v938_v9  ;;  %s291_s14 = scalar_lea.vmem [#allocation5], %s694_s19  ;;  %s1109_s15 = scalar_lea.vmem [#allocation6], %s694_s19 }
  0x3e   : > { %v392_v6 = vld [vmem:[%s1195_s1] sm:$0x3]  ;;  %396 = vperm.xlu0 %787, %v393_v4   ;;  %696 = vmatprep.subr.msk.mxu0 %vm316_vm0, %v311_v3  ;;  %v495_v14 = vshrl.u32 %v494_v11, 7  ;;  %s550_s7 = sshll.u32 %s291_s14, 4  ;;  %s566_s18 = sshll.u32 %s1109_s15, 4  ;;  %s1117_s7 = int_to_ptr.vmem [resolvable:$true] %s550_s7  ;;  %s1124_s18 = int_to_ptr.vmem [resolvable:$true] %s566_s18 }
  0x3f   : > { %699 = vmatprep.subr.msk.mxu1 %vm316_vm0, %v311_v3  ;;  %v304_v7 = vld [vmem:[%s1198_s4] sm:$0x3]  ;;  %697 = vmatpush1.msk.msra.mxu0 %vm316_vm0, %v302_v2  ;;  %v493_v13 = vunpack.c.0.s8 %v492_v10  ;;  %s1115_s28 = scalar_lea.hbm %s1199_s5, %s715_s8  ;;  %s1122_s16 = scalar_lea.hbm %s1200_s6, %s715_s8 }
  0x40   : > { %700 = vmatpush1.msk.msra.mxu1 %vm316_vm0, %v302_v2  ;;  %698 = vmatmul.mubr.msk.f32.vlgmr.msra.gmra.mrb[0].mxu0 %vm312_vm1, %v303_v5  ;;  %s529_s13 = scalar_lea.sflag [#allocation4], %s1087_s30  ;;  %s819_s17 = scalar_lea.vmem %s1117_s7, 32 }
  0x41   : > { %701 = vmatmul.mubr.msk.f32.vlgmr.msra.gmra.mrb[0].mxu1 %vm312_vm1, %v392_v6  ;;  %v496_v22 = vsub.s32 %v493_v13, %v495_v14  ;;  %p820_p8 = scmp.ne.s32.totalorder %s1117_s7, %s819_s17  ;;  %p1209_p9 = scmp.ne.s32.totalorder %s1204_s10, 0 }
  0x42   : > { %307 = vperm.xlu0 %787, %v304_v7   ;;  %s939_s19 = smov [#allocation5]  }
  0x43   : > { %p821_p11 = pnand %p820_p8, %p1209_p9  ;;  %s823_s20 = sshll.u32 %s939_s19, 4  ;;  %s824_s20 = int_to_ptr.vmem [resolvable:$false] %s823_s20 }
  0x44   : > { %s825_s27 = scalar_lea.vmem %s824_s20, 64  ;;  %p826_p7 = scmp.lt.s32.totalorder %s1117_s7, %s824_s20 }
  0x45   : > { %p822_p0 = pneg %p821_p11  ;;  %p827_p13 = scmp.lt.s32.totalorder %s825_s27, %s819_s17 }
  0x47   : > { %p828_p3 = por %p827_p13, %p826_p7 }
  0x49   : > { %p829_p6 = pnand %p828_p3, %p822_p0 }
  0xbd   : > { %v397_v8 = vpop.permute.xlu0 %396 }
  0xc1   : > { %v308_v12 = vpop.permute.xlu0 %307 }
 0x113   : > { %v387_v15 = vpop.f32.mrb[0].mxu0 }
 0x114   : > { %v468_v16 = vpop.f32.mrb[0].mxu1  ;;  %v388_v17 = vadd.f32 %v387_v15, %v308_v12  ;;  %v389_v19 = vpop.f32.mrb[1].mxu0 }
 0x115   : > { %v469_v18 = vadd.f32 %v468_v16, %v397_v8  ;;  %v470_v20 = vpop.f32.mrb[1].mxu1  ;;  %v390_v21 = vadd.f32 %v389_v19, %v308_v12 }
 0x116   : > { %v471_v23 = vadd.f32 %v470_v20, %v397_v8 }
 0x117   : > { %v473_v24 = vmul.f32 0.00390625, %v469_v18  ;;  %v702_v25 = vpack.c.bf16 %v390_v21, %v388_v17 }
 0x118   : > { %v474_v26 = vmul.f32 0.00390625, %v471_v23 }
 0x119   : > { %v497_v27 = vrot.slane %v702_v25, %v496_v22 }
 0x11a   : > { %v704_v28 = vpack.c.bf16 %v474_v26, %v473_v24 }
 0x11b   : > { %703 = vst.sshfl [vmem:[%s291_s14] sm:$0x5 pattern:$0x73625140] %v497_v27 }
 0x11c   : > { %v518_v29 = vrot.slane %v704_v28, %v496_v22 }
 0x11d   : > { %832 = shalt.err (!%p829_p6)
}
 0x11e   : > { %s833_s8 = scalar_lea.hbm %s1115_s28, 32  ;;  %s837_s9 = scalar_lea.hbm %s1199_s5, 64 }
 0x11f   : > { %p834_p4 = scmp.ne.s32.totalorder %s1115_s28, %s833_s8  ;;  %p838_p1 = scmp.lt.u32.totalorder %s1115_s28, %s1199_s5 }
 0x120   : > { %p839_p2 = scmp.lt.u32.totalorder %s837_s9, %s833_s8  ;;  %p841_p8 = scmp.lt.u32.totalorder %s833_s8, %s1115_s28 }
 0x121   : > { %p835_p10 = pnand %p834_p4, %p1209_p9 }
 0x122   : > { %p840_p5 = por %p839_p2, %p838_p1 }
 0x123   : > { %p836_p12 = pneg %p835_p10 }
 0x124   : > { %p842_p11 = por %p841_p8, %p840_p5 }
 0x126   : > { %p843_p0 = pnand %p842_p11, %p836_p12 }
 0x128   : > { %846 = shalt.err (!%p843_p0)
}
 0x129   : > { %719 = dma.vmem_to_hbm [thread:$0]  (%p1209_p9), %s1117_s7, 32, %s1115_s28, %s529_s13   ;;  %705 = vst.sshfl [vmem:[%s1109_s15] sm:$0x5 pattern:$0x73625140] %v518_v29 }
 0x12a   : > { %s534_s17 = scalar_lea.sflag [#allocation7], %s1087_s30  ;;  %s847_s27 = scalar_lea.vmem %s1124_s18, 32 }
 0x12b   : > { %p848_p7 = scmp.ne.s32.totalorder %s1124_s18, %s847_s27  ;;  %s940_s8 = smov [#allocation6]  }
 0x12c   : > { %s851_s14 = sshll.u32 %s940_s8, 4  ;;  %s852_s14 = int_to_ptr.vmem [resolvable:$false] %s851_s14 }
 0x12d   : > { %p849_p13 = pnand %p848_p7, %p1209_p9  ;;  %s853_s24 = scalar_lea.vmem %s852_s14, 64 }
 0x12e   : > { %p854_p6 = scmp.lt.s32.totalorder %s1124_s18, %s852_s14  ;;  %p855_p4 = scmp.lt.s32.totalorder %s853_s24, %s847_s27 }
 0x12f   : > { %p850_p3 = pneg %p849_p13 }
 0x130   : > { %p856_p10 = por %p855_p4, %p854_p6 }
 0x132   : > { %p857_p12 = pnand %p856_p10, %p850_p3 }
 0x134   : > { %860 = shalt.err (!%p857_p12)
}
 0x135   : > { %s861_s30 = scalar_lea.hbm %s1122_s16, 32  ;;  %s865_s28 = scalar_lea.hbm %s1200_s6, 64 }
 0x136   : > { %p862_p1 = scmp.ne.s32.totalorder %s1122_s16, %s861_s30  ;;  %p866_p8 = scmp.lt.u32.totalorder %s1122_s16, %s1200_s6 }
 0x137   : > { %p867_p11 = scmp.lt.u32.totalorder %s865_s28, %s861_s30  ;;  %p869_p7 = scmp.lt.u32.totalorder %s861_s30, %s1122_s16 }
 0x138   : > { %p863_p2 = pnand %p862_p1, %p1209_p9 }
 0x139   : > { %p868_p0 = por %p867_p11, %p866_p8 }
 0x13a   : > { %p864_p5 = pneg %p863_p2 }
 0x13b   : > { %p870_p13 = por %p869_p7, %p868_p0 }
 0x13d   : > { %p871_p3 = pnand %p870_p13, %p864_p5 }
 0x13f   : > { %874 = shalt.err (!%p871_p3)
}
 0x140   : > { %720 = dma.vmem_to_hbm [thread:$0]  (%p1209_p9), %s1124_s18, 32, %s1122_s16, %s534_s17  }
 0x141 PF: > { %s578_s19 = sand.u32 1, %s913_s21   ;;  %p1210_p6 = scmp.ne.s32.totalorder %s1205_s12, 0 }
 0x142   : > { %p1211_p4 = scmp.ge.s32.totalorder %s933_s26, 2  ;;  %s579_s20 = scalar_lea.sflag [#allocation4], %s578_s19 }
 0x144   : > { %p728_p10 = pnand %p1211_p4, %p1210_p6 }
 0x146   : > { %904 = dma.done.wait (!%p728_p10), %s579_s20, 32  }
 0x147   : > { %906 = vsyncadd (!%p728_p10), %s579_s20, 4294967264  ;;  %s588_s27 = scalar_lea.sflag [#allocation7], %s578_s19 }
 0x148   : > { %908 = dma.done.wait (!%p728_p10), %s588_s27, 32  }
 0x149   : > { %910 = vsyncadd (!%p728_p10), %s588_s27, 4294967264  ;;  %s26_s26 = sadd.s32 1, %s933_s26   ;;  %s1212_s21 = smov %s917_s22 }
 0x14a   : > { %p23_p12 = scmp.ge.s32.totalorder %s26_s26, 4   ;;  %s1213_s22 = smov %s921_s23 }
 0x14b   : > { %s1214_s23 = smov %s1032_s11  ;;  %s1215_s24 = smov %s929_s25 }
 0x14c   : > { %s1216_s25 = smov %s1218_s29  ;;  %25 = sbr.rel (!%p23_p12) target bundleno = 8 (0x8), region = 102 }
 0x153   :  { %593 = vsyncpa [#allocation3], 1 }
 0x154   :  { %595 = vsyncpa [#allocation3 + $0x1], 1 }
 0x155   :  { %596 = vsyncpa [#allocation4], 1 }
 0x156   :  { %598 = vsyncpa [#allocation4 + $0x1], 1 }
 0x157   :  { %599 = vsyncpa [#allocation7], 1 }
 0x158   :  { %601 = vsyncpa [#allocation7 + $0x1], 1 }

</bundles_post_ra>
